<compile_context>
chip_gen: v7x
topology: tpu7x:2x2x1
jax: 0.10.0
libtpu: 0.0.40
codegen_flags: <defaults>
</compile_context>

<pallas_src>
import jax
import jax.numpy as jnp
from jax.experimental import pallas as pl
from jax.experimental.pallas import tpu as pltpu


def _round_up(x, m):
    return ((x + m - 1) // m) * m


def _attn_kernel(gap_ref, w_ref, b_ref, attn_t_ref):
    """Per-batch channel-attention matrix, written pre-transposed.

    gap_ref    : (1, 1, C)  f32   global-average-pooled features
    w_ref      : (C, 2C)    f32   1x1-conv weight, pre-transposed (in, out)
    b_ref      : (1, 2C)    f32   1x1-conv bias
    attn_t_ref : (1, C, C)        A^T, i.e. attn_t[j, i] = softmax_j(g1[i]*g2[j])
    """
    C = attn_t_ref.shape[1]
    gap_row = gap_ref[0]                                            # (1, C)

    # 1x1 conv on the pooled vector == dense layer; single fused matmul,
    # weight already transposed in the wrapper (no in-kernel .T).
    g = jnp.dot(gap_row, w_ref[...],
                preferred_element_type=jnp.float32) + b_ref[...]    # (1, 2C)
    g1 = g[:, :C]                                                   # (1, C)
    g2 = g[:, C:]                                                   # (1, C)

    # logits[i, j] = g1[i] * g2[j]; softmax over j.
    logits = g1.T * g2                                              # (C, C)
    m = jnp.max(logits, axis=-1, keepdims=True)
    e = jnp.exp(logits - m)
    inv = pl.reciprocal(jnp.sum(e, axis=-1, keepdims=True), approx=True)
    attn = e * inv                                                  # (C, C)

    # Transpose ONCE per batch (amortized over all spatial tiles).
    attn_t_ref[0] = attn.T.astype(attn_t_ref.dtype)


def _mix_kernel(attn_t_ref, x_ref, o_ref):
    """out[j, p] = sum_i attn[i, j] * x[i, p]  ==  A^T @ x_tile (streaming)."""
    o_ref[0] = jnp.dot(attn_t_ref[0], x_ref[0],
                       preferred_element_type=jnp.float32).astype(o_ref.dtype)


def channel_reweight(x, conv_w, conv_b, *,
                     compute_dtype=jnp.bfloat16, tile_hw=2048):
    """x: (B, C, H, W) f32; conv_w: (2C, C) f32; conv_b: (2C,) f32."""
    B, C, H, W = x.shape
    HW = H * W
    x_flat = x.reshape(B, C, HW)

    # --- GAP with the TRUE divisor, before any spatial padding (tiny reduce,
    #     plain JAX/XLA is fine per perf review). -----------------------------
    gap = jnp.mean(x_flat.astype(jnp.float32), axis=-1).reshape(B, 1, C)

    # Pre-transpose and fuse the 1x1-conv params once in the wrapper.
    w_t = conv_w.T.astype(jnp.float32)                 # (C, 2C)
    b2d = conv_b.reshape(1, 2 * C).astype(jnp.float32)  # (1, 2C)

    in_bytes = jnp.dtype(compute_dtype).itemsize
    out_bytes = jnp.dtype(x.dtype).itemsize

    # --- kernel 1: per-batch attention matrix (already transposed, bf16). ----
    attn_cost = pl.CostEstimate(
        flops=B * (4 * C * C + 4 * C * C),
        transcendentals=B * C * C,
        bytes_accessed=B * C * 4 + 2 * C * C * 4 + 2 * C * 4 + B * C * C * in_bytes,
    )
    attn_t = pl.pallas_call(
        _attn_kernel,
        out_shape=jax.ShapeDtypeStruct((B, C, C), compute_dtype),
        grid_spec=pltpu.PrefetchScalarGridSpec(
            num_scalar_prefetch=0,
            grid=(B,),
            in_specs=[
                pl.BlockSpec((1, 1, C), lambda i: (i, 0, 0)),
                pl.BlockSpec((C, 2 * C), lambda i: (0, 0)),
                pl.BlockSpec((1, 2 * C), lambda i: (0, 0)),
            ],
            out_specs=pl.BlockSpec((1, C, C), lambda i: (i, 0, 0)),
        ),
        compiler_params=pltpu.CompilerParams(
            dimension_semantics=("parallel",)),
        cost_estimate=attn_cost,
    )(gap, w_t, b2d)

    # --- kernel 2: lane-dense spatial tiling of the streaming matmul. --------
    # Tile size: multiple of 128 lanes, capped so double-buffered in+out tiles
    # stay small even on v7x's 64 MiB VMEM; HW is zero-padded up to a multiple.
    t_hw = _round_up(min(tile_hw, _round_up(HW, 128)), 128)
    hw_pad = _round_up(HW, t_hw)
    n_t = hw_pad // t_hw

    x_c = x_flat.astype(compute_dtype)
    if hw_pad != HW:
        x_c = jnp.pad(x_c, ((0, 0), (0, 0), (0, hw_pad - HW)))

    mix_cost = pl.CostEstimate(
        flops=2 * B * C * C * hw_pad,
        transcendentals=0,
        bytes_accessed=B * C * hw_pad * (in_bytes + out_bytes)
                       + B * C * C * in_bytes,
    )
    out_flat = pl.pallas_call(
        _mix_kernel,
        out_shape=jax.ShapeDtypeStruct((B, C, hw_pad), x.dtype),
        grid_spec=pltpu.PrefetchScalarGridSpec(
            num_scalar_prefetch=0,
            grid=(B, n_t),
            in_specs=[
                pl.BlockSpec((1, C, C), lambda b, t: (b, 0, 0)),
                pl.BlockSpec((1, C, t_hw), lambda b, t: (b, 0, t)),
            ],
            out_specs=pl.BlockSpec((1, C, t_hw), lambda b, t: (b, 0, t)),
        ),
        compiler_params=pltpu.CompilerParams(
            dimension_semantics=("parallel", "parallel"),
            vmem_limit_bytes=32 * 1024 * 1024),
        cost_estimate=mix_cost,
    )(attn_t, x_c)

    return out_flat[:, :, :HW].reshape(B, C, H, W)


def _reference(x, conv_w, conv_b):
    B, C, H, W = x.shape
    gap = jnp.mean(x, axis=(2, 3))                        # (B, C)
    g = gap @ conv_w.T + conv_b                           # (B, 2C)
    g1, g2 = g[:, :C], g[:, C:]
    logits = g1[:, :, None] * g2[:, None, :]              # (B, C, C)
    attn = jax.nn.softmax(logits, axis=-1)
    x_flat = x.reshape(B, C, H * W)
    out = jnp.einsum("bip,bij->bjp", x_flat, attn)
    return out.reshape(B, C, H, W)


if __name__ == "__main__":
    key = jax.random.PRNGKey(0)
    kx, kw, kb = jax.random.split(key, 3)

    B, C, H, W = 2, 4, 16, 16
    x = jax.random.normal(kx, (B, C, H, W), dtype=jnp.float32)
    conv_w = 0.1 * jax.random.normal(kw, (2 * C, C), dtype=jnp.float32)
    conv_b = 0.1 * jax.random.normal(kb, (2 * C,), dtype=jnp.float32)

    ref = jax.block_until_ready(_reference(x, conv_w, conv_b))

    # Default perf path: bf16 streaming matmul with f32 accumulation.
    out = jax.block_until_ready(channel_reweight(x, conv_w, conv_b))
    assert out.shape == (B, C, H, W)
    assert out.dtype == x.dtype
    assert jnp.allclose(out, ref, atol=5e-2, rtol=5e-2), "bf16 path mismatch vs reference"

    # f32 compute path: tighter numerical check of the same kernels.
    out_f32 = jax.block_until_ready(
        channel_reweight(x, conv_w, conv_b, compute_dtype=jnp.float32))
    assert jnp.allclose(out_f32, ref, atol=2e-2, rtol=2e-2), "f32 path mismatch vs reference"

    # Non-multiple-of-128 spatial size: exercises HW padding + true-divisor GAP.
    B2, C2, H2, W2 = 2, 4, 10, 10
    x2 = jax.random.normal(kx, (B2, C2, H2, W2), dtype=jnp.float32)
    out2 = jax.block_until_ready(channel_reweight(x2, conv_w, conv_b))
    ref2 = jax.block_until_ready(_reference(x2, conv_w, conv_b))
    assert out2.shape == (B2, C2, H2, W2)
    assert jnp.allclose(out2, ref2, atol=5e-2, rtol=5e-2), "padded-HW path mismatch"

    print("KERNEL_OK")
</pallas_src>

<mosaic_0001>
module attributes {stable_mosaic.version = 11 : i64} {
  func.func @_attn_kernel(%arg0: i32, %arg1: memref<1x1x4xf32, #tpu.memory_space<vmem>>, %arg2: memref<4x8xf32, #tpu.memory_space<vmem>>, %arg3: memref<1x8xf32, #tpu.memory_space<vmem>>, %arg4: memref<1x4x4xbf16, #tpu.memory_space<vmem>>) attributes {dimension_semantics = [#tpu.dimension_semantics<parallel>], iteration_bounds = array<i64: 2>, scalar_prefetch = 0 : i64, scratch_operands = 0 : i64, tpu.core_type = #tpu.core_type<tc>, window_params = [{transform_indices = @transform_0, window_bounds = array<i64: 1, 1, 4>}, {pipeline_mode = #tpu.pipeline_mode<synchronous>, transform_indices = @transform_1, window_bounds = array<i64: 4, 8>}, {pipeline_mode = #tpu.pipeline_mode<synchronous>, transform_indices = @transform_2, window_bounds = array<i64: 1, 8>}, {transform_indices = @transform_3, window_bounds = array<i64: 1, 4, 4>}]} {
    %c0 = arith.constant 0 : index
    %c0_0 = arith.constant 0 : index
    %c0_1 = arith.constant 0 : index
    %0 = vector.load %arg1[%c0, %c0_0, %c0_1] : memref<1x1x4xf32, #tpu.memory_space<vmem>>, vector<1x1x4xf32>
    %1 = vector.shape_cast %0 : vector<1x1x4xf32> to vector<1x4xf32>
    %c0_2 = arith.constant 0 : index
    %c0_3 = arith.constant 0 : index
    %2 = vector.load %arg2[%c0_2, %c0_3] : memref<4x8xf32, #tpu.memory_space<vmem>>, vector<4x8xf32>
    %cst = arith.constant dense<0.000000e+00> : vector<1x8xf32>
    %3 = tpu.matmul %1, %2, %cst {dimension_numbers = #tpu.dot_dimension_numbers<[1], [0], [0], [1], [0, 0, 1, 1], [], []>} : vector<1x4xf32>, vector<4x8xf32>, vector<1x8xf32> -> vector<1x8xf32>
    %c0_4 = arith.constant 0 : index
    %c0_5 = arith.constant 0 : index
    %4 = vector.load %arg3[%c0_4, %c0_5] : memref<1x8xf32, #tpu.memory_space<vmem>>, vector<1x8xf32>
    %5 = arith.addf %3, %4 : vector<1x8xf32>
    %6 = vector.extract_strided_slice %5 {offsets = [0, 0], sizes = [1, 4], strides = [1, 1]} : vector<1x8xf32> to vector<1x4xf32>
    %7 = vector.extract_strided_slice %5 {offsets = [0, 4], sizes = [1, 4], strides = [1, 1]} : vector<1x8xf32> to vector<1x4xf32>
    %8 = tpu.transpose %6, [1, 0] : vector<1x4xf32> -> vector<4x1xf32>
    %9 = vector.broadcast %8 : vector<4x1xf32> to vector<4x4xf32>
    %10 = vector.broadcast %7 : vector<1x4xf32> to vector<4x4xf32>
    %11 = arith.mulf %9, %10 : vector<4x4xf32>
    %cst_6 = arith.constant dense<0xFF800000> : vector<4xf32>
    %12 = vector.multi_reduction <maximumf>, %11, %cst_6 [1] : vector<4x4xf32> to vector<4xf32>
    %13 = vector.shape_cast %12 : vector<4xf32> to vector<4x1xf32>
    %14 = vector.broadcast %13 : vector<4x1xf32> to vector<4x4xf32>
    %15 = arith.subf %11, %14 : vector<4x4xf32>
    %16 = math.exp %15 : vector<4x4xf32>
    %cst_7 = arith.constant dense<0.000000e+00> : vector<4xf32>
    %17 = vector.multi_reduction <add>, %16, %cst_7 [1] : vector<4x4xf32> to vector<4xf32>
    %18 = vector.shape_cast %17 : vector<4xf32> to vector<4x1xf32>
    %19 = tpu.reciprocal %18 {approx = true} : vector<4x1xf32> -> vector<4x1xf32>
    %20 = vector.broadcast %19 : vector<4x1xf32> to vector<4x4xf32>
    %21 = arith.mulf %16, %20 : vector<4x4xf32>
    %22 = tpu.transpose %21, [1, 0] : vector<4x4xf32> -> vector<4x4xf32>
    %23 = arith.truncf %22 : vector<4x4xf32> to vector<4x4xbf16>
    %c0_8 = arith.constant 0 : index
    %c0_9 = arith.constant 0 : index
    %c0_10 = arith.constant 0 : index
    %24 = vector.load %arg4[%c0_8, %c0_9, %c0_10] : memref<1x4x4xbf16, #tpu.memory_space<vmem>>, vector<1x4x4xbf16>
    %25 = vector.shape_cast %24 : vector<1x4x4xbf16> to vector<4x4xbf16>
    %26 = vector.shape_cast %23 : vector<4x4xbf16> to vector<1x4x4xbf16>
    tpu.vector_store %arg4[%c0_8, %c0_9, %c0_10], %26 {strides = array<i32>} : memref<1x4x4xbf16, #tpu.memory_space<vmem>>, vector<1x4x4xbf16>,
    return
  }
  func.func @transform_0(%arg0: i32) -> (i32, i32, i32) {
    %c0_i32 = arith.constant 0 : i32
    %c0_i32_0 = arith.constant 0 : i32
    %c0_i32_1 = arith.constant 0 : i32
    return %arg0, %c0_i32, %c0_i32_0 : i32, i32, i32
  }
  func.func @transform_1(%arg0: i32) -> (i32, i32) {
    %c0_i32 = arith.constant 0 : i32
    %c0_i32_0 = arith.constant 0 : i32
    %c0_i32_1 = arith.constant 0 : i32
    return %c0_i32, %c0_i32_0 : i32, i32
  }
  func.func @transform_2(%arg0: i32) -> (i32, i32) {
    %c0_i32 = arith.constant 0 : i32
    %c0_i32_0 = arith.constant 0 : i32
    %c0_i32_1 = arith.constant 0 : i32
    return %c0_i32, %c0_i32_0 : i32, i32
  }
  func.func @transform_3(%arg0: i32) -> (i32, i32, i32) {
    %c0_i32 = arith.constant 0 : i32
    %c0_i32_0 = arith.constant 0 : i32
    %c0_i32_1 = arith.constant 0 : i32
    return %arg0, %c0_i32, %c0_i32_0 : i32, i32, i32
  }
}

</mosaic_0001>

<bundles_post_ra>
// kernel: tpu_custom_call.1
= control target key start
LH: loop header
LB: loop body
LE: loop exit
PB: predicated region body
PF: predicated region fallthrough
CT: control target
= control target key end

     0   :  { %8 = vsyncpa [#allocation3], 0  ;;  %s915_s0 = inlined_call_operand.hbm [shape: f32[2,1,4], index: 0, kind: input, shape index: {}]   ;;  %s916_s1 = inlined_call_operand.hbm [shape: f32[4,8], index: 1, kind: input, shape index: {}]   ;;  %s917_s2 = inlined_call_operand.vmem [shape: f32[1,8], index: 2, kind: input, shape index: {}]   ;;  %s918_s3 = inlined_call_operand.hbm [shape: bf16[2,4,4], index: 3, kind: output, shape index: {}]  }
   0x1   :  { %10 = vsyncpa [#allocation3 + $0x1], 0 }
   0x2   :  { %11 = vsyncpa [#allocation6], 0 }
   0x3   :  { %12 = vsyncpa [#allocation4], 0 }
   0x4   :  { %14 = vsyncpa [#allocation4 + $0x1], 0  ;;  %s710_s12 = smov 0   ;;  %s712_s13 = smov 0  }
   0x5   :  { %s714_s14 = smov 0   ;;  %s716_s15 = smov 0  }
   0x6 LB: > { %s731_s16 = sadd.s32 4294967295, %s681_s15   ;;  %s466_s17 = sadd.s32 4294967294, %s681_s15   ;;  %s681_s15 = sphi %s716_s15, %s942_s15   ;;  %s677_s14 = sphi %s714_s14, %s941_s14   ;;  %s673_s13 = sphi %s712_s13, %s940_s13   ;;  %s669_s12 = sphi %s710_s12, %s939_s12  }
   0x7   : > { %p40_p0 = scmp.ne.s32.totalorder %s673_s13, %s669_s12  ;;  %p919_p1 = scmp.eq.s32.totalorder %s731_s16, 0 }
   0x8   : > { %p112_p3 = scmp.eq.s32.totalorder %s466_s17, 1  ;;  %p467_p5 = scmp.ge.s32.totalorder %s681_s15, 1 }
   0x9   : > { %p740_p4 = por %p919_p1, %p40_p0  ;;  %p119_p7 = scmp.lt.s32.totalorder %s681_s15, 3 }
   0xa   : > { %p745_p6 = por %p112_p3, %p40_p0  ;;  %s683_s21 = smov [#allocation5]  }
   0xb   : > { %s922_s18 = scalar_select %p740_p4, 1, 0 }
   0xc   : > { %s923_s19 = scalar_select %p745_p6, 1, 0 }
   0xd   : > { %p750_p8 = pnand %p467_p5, %p119_p7  ;;  %s132_s22 = sshll.u32 %s683_s21, 4  ;;  %s133_s22 = int_to_ptr.vmem [resolvable:$true] %s132_s22 }
   0xe   : > { %s758_s23 = sadd.s32 1, %s681_s15   ;;  %s27_s27 = sadd.s32 1, %s677_s14 }
   0xf   : > { %s924_s20 = scalar_select %p750_p8, 1, 0 }
  0x10   : > { %p495_p10 = pneg %p750_p8  ;;  %s24_s25 = ssub.s32 %s681_s15, %s758_s23 }
  0x11   : > { %p768_p12 = scmp.eq.s32.totalorder %s24_s25, 0  ;;  %s553_s30 = scalar_lea.hbm %s916_s1, 64 }
  0x12   : > { %p762_p11 = pnand %p495_p10, %p919_p1  ;;  %p554_p0 = scmp.ne.s32.totalorder %s916_s1, %s553_s30 }
  0x13   : > { %s926_s26 = scalar_select %p768_p12, 1, 0 }
  0x14   : > { %p555_p3 = pneg %p762_p11  ;;  %p560_p10 = scmp.lt.u32.totalorder %s553_s30, %s916_s1 }
  0x16   : > { %p556_p5 = pnand %p555_p3, %p554_p0 }
  0x18   : > { %p557_p7 = pneg %p556_p5 }
  0x1a   : > { %p562_p9 = pnand %p560_p10, %p557_p7 }
  0x1c   : > { %565 = shalt.err (!%p562_p9)
}
  0x1d   : > { %s566_s8 = scalar_lea.vmem %s133_s22, 64  ;;  %p574_p6 = scmp.lt.s32.totalorder %s133_s22, %s133_s22 }
  0x1e   : > { %p567_p1 = scmp.ne.s32.totalorder %s133_s22, %s566_s8  ;;  %p575_p4 = scmp.lt.s32.totalorder %s566_s8, %s566_s8 }
  0x20   : > { %p569_p2 = pnand %p567_p1, %p555_p3  ;;  %p576_p8 = por %p575_p4, %p574_p6 }
  0x22   : > { %p570_p13 = pneg %p569_p2 }
  0x24   : > { %p577_p12 = pnand %p576_p8, %p570_p13 }
  0x26   : > { %580 = shalt.err (!%p577_p12)
}
  0x27   : > { %498 = dma.hbm_to_vmem [thread:$0]  (!%p762_p11), %s916_s1, 64, %s133_s22, [#allocation6]  }
  0x28   : > { %p927_p1 = scmp.ne.s32.totalorder %s926_s26, 0  ;;  %p35_p2 = scmp.eq.s32.totalorder %s681_s15, 0 }
  0x29   : > { %p928_p4 = scmp.ne.s32.totalorder %s677_s14, %s673_s13  ;;  %p929_p6 = scmp.eq.s32.totalorder %s731_s16, 1 }
  0x2a   : > { %s794_s11 = scalar_select %p927_p1, %s677_s14, %s27_s27  }
  0x2b   : > { %p802_p8 = por %p929_p6, %p928_p4  ;;  %p508_p9 = scmp.lt.s32.totalorder %s681_s15, 2 }
  0x2c   : > { %s146_s21 = sand.u32 1, %s677_s14   ;;  %p931_p12 = pmov %p928_p4 }
  0x2d   : > { %s470_s24 = sshll.u32 %s681_s15, 4  ;;  %s149_s22 = scalar_lea.vmem [#allocation2], %s146_s21 }
  0x2e   : > { %p36_p13 = por %p35_p2, %p931_p12  ;;  %s815_s29 = scalar_lea.hbm %s915_s0, %s470_s24 }
  0x2f   : > { %s156_s26 = sshll.u32 %s149_s22, 4  ;;  %s147_s30 = scalar_lea.sflag [#allocation3], %s146_s21  ;;  %s817_s26 = int_to_ptr.vmem [resolvable:$true] %s156_s26 }
  0x30   : > { %p819_p11 = pnand %p508_p9, %p36_p13  ;;  %s581_s4 = scalar_lea.hbm %s815_s29, 16 }
  0x31   : > { %p582_p0 = scmp.ne.s32.totalorder %s815_s29, %s581_s4  ;;  %s586_s7 = scalar_lea.hbm %s915_s0, 32 }
  0x32   : > { %p583_p3 = pneg %p819_p11  ;;  %p587_p10 = scmp.lt.u32.totalorder %s815_s29, %s915_s0 }
  0x33   : > { %p588_p1 = scmp.lt.u32.totalorder %s586_s7, %s581_s4  ;;  %p590_p4 = scmp.lt.u32.totalorder %s581_s4, %s815_s29 }
  0x34   : > { %p584_p5 = pnand %p583_p3, %p582_p0 }
  0x35   : > { %p589_p2 = por %p588_p1, %p587_p10 }
  0x36   : > { %p585_p7 = pneg %p584_p5 }
  0x37   : > { %p591_p6 = por %p590_p4, %p589_p2 }
  0x39   : > { %p592_p9 = pnand %p591_p6, %p585_p7 }
  0x3b   : > { %595 = shalt.err (!%p592_p9)
}
  0x3c   : > { %s596_s10 = scalar_lea.vmem %s817_s26, 16  ;;  %s684_s21 = smov [#allocation2]  }
  0x3d   : > { %p597_p12 = scmp.ne.s32.totalorder %s817_s26, %s596_s10  ;;  %s601_s24 = sshll.u32 %s684_s21, 4  ;;  %s602_s24 = int_to_ptr.vmem [resolvable:$false] %s601_s24 }
  0x3e   : > { %s603_s25 = scalar_lea.vmem %s602_s24, 32  ;;  %p604_p5 = scmp.lt.s32.totalorder %s817_s26, %s602_s24 }
  0x3f   : > { %p599_p13 = pnand %p597_p12, %p583_p3  ;;  %p605_p10 = scmp.lt.s32.totalorder %s603_s25, %s596_s10 }
  0x41   : > { %p600_p0 = pneg %p599_p13  ;;  %p606_p1 = por %p605_p10, %p604_p5 }
  0x43   : > { %p607_p2 = pnand %p606_p1, %p600_p0 }
  0x45   : > { %610 = shalt.err (!%p607_p2)
}
  0x46   : > { %502 = dma.hbm_to_vmem [thread:$0]  (!%p819_p11), %s815_s29, 16, %s817_s26, %s147_s30  }
  0x47   : > { %p933_p7 = scmp.ne.s32.totalorder %s924_s20, 0 }
  0x48   : > { %s851_s28 = sand.u32 (!%p933_p7), 1, %s673_s13   ;;  %p934_p3 = scmp.ne.s32.totalorder (!%p933_p7), %s922_s18, 0 }
  0x49   : > { %165 = sbr.rel (%p933_p7) target bundleno = 1249 (0x4e1), region = 32  ;;  %s168_s22 = scalar_lea.sflag (!%p933_p7), [#allocation3], %s851_s28 }
  0x4a   : > { %s170_s4 = scalar_lea.vmem (!%p933_p7), [#allocation2], %s851_s28 }
  0x50   : > { %656 = dma.done.wait (%p934_p3), %s168_s22, 16  }
  0x51   : > { %658 = vsyncadd (%p934_p3), %s168_s22, 4294967280  ;;  %p935_p4 = scmp.eq.s32.totalorder %s731_s16, 0 }
  0x53   : > { %660 = dma.done.wait (%p935_p4), [#allocation6], 64   ;;  %p936_p11 = pmov %p935_p4 }
  0x54   : > { %v685_v0 = vmov 0.0   ;;  %vm686_vm0 = vmmov 0   ;;  %vm203_vm1 = vcmask 1043456   ;;  %vm199_vm2 = vcmask 31744   ;;  %v197_v1 = vld [vmem:[#allocation5] sm:$0xf] }
  0x55   : > { %662 = vsyncadd (%p936_p11), [#allocation6], 4294967232  ;;  %482 = vmatprep.subr.mxu0 %v685_v0  ;;  %484 = vmatprep.mubr.msk.f32.mxu0 %vm686_vm0, %v685_v0  ;;  %v196_v2 = vld [vmem:[%s170_s4] sm:$0x1]  ;;  %v687_v7 = vmov 0   ;;  %v314_v9 = vlaneseq  ;;  %vm319_vm3 = vcmask 60448  }
  0x56   : > { %483 = vmatpush3.msk.msra.mxu0 %vm203_vm1, %v197_v1  ;;  %v198_v3 = vld [vmem:[%s917_s2] sm:$0x1]  ;;  %s688_s18 = smov 124   ;;  %vm330_vm4 = vcmask 27648   ;;  %s473_s26 = sshll.u32 %s851_s28, 1  ;;  %vm373_vm5 = vcmask 25600  }
  0x57   : > { %485 = vmatmul.mubr.msk.f32.vlgmr.msra.gmra.mrb[0].mxu0 %vm199_vm2, %v196_v2  ;;  %v315_v10 = vshrl.u32 %v314_v9, 7  ;;  %s477_s27 = sshll.u32 %s731_s16, 5  ;;  %s195_s30 = scalar_lea.vmem [#allocation7], %s473_s26 }
  0x58   : > { %s389_s5 = sshll.u32 %s195_s30, 4  ;;  %s871_s8 = scalar_lea.hbm %s918_s3, %s477_s27  ;;  %s873_s5 = int_to_ptr.vmem [resolvable:$true] %s389_s5 }
  0x59   : > { %v316_v11 = vsub.s32 0, %v315_v10  ;;  %s376_s9 = scalar_lea.sflag [#allocation4], %s851_s28  ;;  %s611_s10 = scalar_lea.vmem %s873_s5, 32 }
  0x5a   : > { %p612_p6 = scmp.ne.s32.totalorder %s873_s5, %s611_s10  ;;  %s689_s16 = smov [#allocation7]  }
  0x5b   : > { %s615_s21 = sshll.u32 %s689_s16, 4  ;;  %s616_s21 = int_to_ptr.vmem [resolvable:$false] %s615_s21 }
  0x5c   : > { %p613_p9 = pnand %p612_p6, %p802_p8  ;;  %s617_s24 = scalar_lea.vmem %s616_s21, 64 }
  0x5d   : > { %p618_p13 = scmp.lt.s32.totalorder %s873_s5, %s616_s21  ;;  %p619_p0 = scmp.lt.s32.totalorder %s617_s24, %s611_s10 }
  0x5e   : > { %p614_p12 = pneg %p613_p9 }
  0x5f   : > { %p620_p5 = por %p619_p0, %p618_p13 }
  0x61   : > { %p621_p10 = pnand %p620_p5, %p614_p12 }
 0x12a   : > { %v273_v4 = vpop.f32.mrb[0].mxu0 }
 0x12b   : > { %v274_v5 = vadd.f32 %v273_v4, %v198_v3  ;;  %v486_v6 = vpop.f32.mrb[1].mxu0 }
 0x12d   : > { %277 = vxpose.xlu0.b32.start.end [1/1] (short) (narrow) %v274_v5, 8  ;;  %v317_v12 = vrot.slane %v274_v5, %v316_v11 }
 0x156   : > { %548 = vset.pattern.permute.xlu0 %v687_v7 }
 0x1ad   : > { %v293_v8 = vpop.trf.xlu0 }
 0x1ae   : > { %311 = vperm.xlu0 %548, %v293_v8  }
 0x22d   : > { %v312_v13 = vpop.permute.xlu0 %311 }
 0x22e   : > { %v318_v14 = vmul.f32 %v317_v12, %v312_v13 }
 0x230   : > { %v320_v15 = vsel %vm319_vm3, %v318_v14, -inf }
 0x231   : > { %321 = vmax.xlane.f32.xlu1 %v320_v15 }
 0x2be   : > { %v322_v16 = vpop.xlane.xlu1 %321 }
 0x2bf   : > { %v323_v17 = vsub.f32 %v318_v14, %v322_v16 }
 0x2c1   : > { %v324_v18 = vmul.f32 1.442695, %v323_v17 }
 0x2c3   : > { %549 = vpow2.f32 %v324_v18 }
 0x2cd   : > { %v550_v19 = vpop.eup %549 }
 0x2ce   : > { %327 = vrot.lane.b32.xlu1 %v550_v19, %s688_s18 }
 0x340   : > { %v328_v20 = vpop.permute.xlu1 %327 }
 0x341   : > { %v331_v21 = vsel %vm330_vm4, %v328_v20, 0.0 }
 0x342   : > { %332 = vadd.xlane.f32.xlu1 %v331_v21 }
 0x3cf   : > { %v333_v22 = vpop.xlane.xlu1 %332 }
 0x3d0   : > { %551 = vrcp.f32 %v333_v22 }
 0x3da   : > { %v552_v23 = vpop.eup %551 }
 0x3db   : > { %v335_v24 = vmul.f32 %v552_v23, %v550_v19 }
 0x3dd   : > { %337 = vrot.lane.b32.xlu0 %v335_v24, %s688_s18 }
 0x44f   : > { %v338_v25 = vpop.permute.xlu0 %337 }
 0x450   : > { %340 = vxpose.xlu0.b32.start.end [1/1] (short) (narrow) %v338_v25, 8 }
 0x4d0   : > { %v356_v26 = vpop.trf.xlu0 }
 0x4d1   : > { %v372_v27 = vpack.c.bf16 %v356_v26, %v356_v26 }
 0x4d3   : > { %374 = vst.msk [vmem:[%s195_s30] sm:$0x3] %vm373_vm5, %v372_v27 }
 0x4d4   : > { %624 = shalt.err (!%p621_p10)
}
 0x4d5   : > { %s625_s25 = scalar_lea.hbm %s871_s8, 32  ;;  %s629_s4 = scalar_lea.hbm %s918_s3, 64 }
 0x4d6   : > { %p626_p1 = scmp.ne.s32.totalorder %s871_s8, %s625_s25  ;;  %p630_p3 = scmp.lt.u32.totalorder %s871_s8, %s918_s3 }
 0x4d7   : > { %p631_p4 = scmp.lt.u32.totalorder %s629_s4, %s625_s25  ;;  %p633_p6 = scmp.lt.u32.totalorder %s625_s25, %s871_s8 }
 0x4d8   : > { %p627_p2 = pnand %p626_p1, %p802_p8 }
 0x4d9   : > { %p632_p11 = por %p631_p4, %p630_p3 }
 0x4da   : > { %p628_p7 = pneg %p627_p2 }
 0x4db   : > { %p634_p9 = por %p633_p6, %p632_p11 }
 0x4dd   : > { %p635_p12 = pnand %p634_p9, %p628_p7 }
 0x4df   : > { %638 = shalt.err (!%p635_p12)
}
 0x4e0   : > { %493 = dma.vmem_to_hbm [thread:$0]  (%p802_p8), %s873_s5, 32, %s871_s8, %s376_s9  }
 0x4e1 PF: > { %s401_s18 = sand.u32 1, %s669_s12   ;;  %p937_p13 = scmp.ne.s32.totalorder %s923_s19, 0 }
 0x4e2   : > { %p938_p0 = scmp.ge.s32.totalorder %s681_s15, 2  ;;  %s402_s26 = scalar_lea.sflag [#allocation4], %s401_s18 }
 0x4e4   : > { %p504_p5 = pnand %p938_p0, %p937_p13 }
 0x4e6   : > { %664 = dma.done.wait (!%p504_p5), %s402_s26, 32  }
 0x4e7   : > { %666 = vsyncadd (!%p504_p5), %s402_s26, 4294967264  ;;  %p17_p10 = scmp.ge.s32.totalorder %s758_s23, 4   ;;  %s939_s12 = smov %s673_s13 }
 0x4e8   : > { %s940_s13 = smov %s677_s14  ;;  %s941_s14 = smov %s794_s11 }
 0x4e9   : > { %s942_s15 = smov %s758_s23  ;;  %19 = sbr.rel (!%p17_p10) target bundleno = 6 (0x6), region = 81 }
 0x4f0   :  { %407 = vsyncpa [#allocation3], 1 }
 0x4f1   :  { %409 = vsyncpa [#allocation3 + $0x1], 1 }
 0x4f2   :  { %410 = vsyncpa [#allocation6], 1 }
 0x4f3   :  { %411 = vsyncpa [#allocation4], 1 }
 0x4f4   :  { %413 = vsyncpa [#allocation4 + $0x1], 1 }

</bundles_post_ra>
